<compile_context>
chip_gen: v7x
topology: tpu7x:2x2x1
jax: 0.10.0
libtpu: 0.0.40
codegen_flags: <defaults>
</compile_context>

<pallas_src>
import functools

import jax
import jax.numpy as jnp
from jax.experimental import pallas as pl
from jax.experimental.pallas import tpu as pltpu

_LANE = 128
_NEG_BIG = -1e30  # masked (padded) logit columns -> exp underflows to exactly 0


def _round_up(n, m):
    return ((n + m - 1) // m) * m


def _pad2(a, rows, cols):
    return jnp.pad(a, ((0, rows - a.shape[0]), (0, cols - a.shape[1])))


def _pick_batch_tile(batch):
    """Batch tile: full batch when tiny (block dim == array dim is always legal),
    otherwise 8-row-aligned, >=2 grid steps when possible, capped at 512 rows."""
    if batch <= 8:
        return batch
    tb = _round_up(pl.cdiv(batch, 2), 8)
    return min(512, tb)


def _ann_kernel(x_ref, w1_ref, b1_ref, w2_ref, b2_ref, w3_ref, b3_ref, out_ref,
                *, num_valid_out):
    # x: f32 [TB, IN]  -> cast to bf16 here (fuses the cast into the pipeline,
    # saving the extra HBM read/write pass a wrapper-side cast would cost).
    x = x_ref[...].astype(jnp.bfloat16)

    # layer1 + ReLU (bf16 MXU matmul, f32 accumulate)
    h1 = jnp.dot(x, w1_ref[...], preferred_element_type=jnp.float32) + b1_ref[...]
    h1 = jnp.maximum(h1, 0.0).astype(jnp.bfloat16)

    # layer2 + ReLU
    h2 = jnp.dot(h1, w2_ref[...], preferred_element_type=jnp.float32) + b2_ref[...]
    h2 = jnp.maximum(h2, 0.0).astype(jnp.bfloat16)

    # layer3 (padded to 128 lanes for the MXU) + softmax over the feature axis
    logits = jnp.dot(h2, w3_ref[...], preferred_element_type=jnp.float32) + b3_ref[...]

    # Padded logit columns -> huge negative -> exp == 0 -> softmax unaffected.
    col = jax.lax.broadcasted_iota(jnp.int32, logits.shape, 1)
    logits = jnp.where(col < num_valid_out, logits, _NEG_BIG)

    m = jnp.max(logits, axis=-1, keepdims=True)
    e = jnp.exp(logits - m)
    denom = jnp.sum(e, axis=-1, keepdims=True)
    probs = e * pl.reciprocal(denom, approx=False)  # exact normalization

    # Narrow store: only the valid class columns go back to HBM.
    out_ref[...] = probs[:, :num_valid_out].astype(out_ref.dtype)


def prepare_params(w1, b1, w2, b2, w3, b3):
    """Pad/cast weights ONCE (outside the jitted forward).

    Weights are [in, out] (transpose of PyTorch's [out, in]); biases [1, out].
    Hidden/output widths are zero-padded to a full 128-lane width; zero padding
    is exact through the ReLU layers, padded logit columns are masked in-kernel.
    """
    in_features = w1.shape[0]
    hid1, hid2 = w1.shape[1], w2.shape[1]
    out_features = w3.shape[1]

    h1p = _round_up(hid1, _LANE)
    h2p = _round_up(hid2, _LANE)
    outp = _round_up(out_features, _LANE)

    padded = (
        _pad2(w1, in_features, h1p).astype(jnp.bfloat16),
        _pad2(b1, 1, h1p).astype(jnp.float32),
        _pad2(w2, h1p, h2p).astype(jnp.bfloat16),
        _pad2(b2, 1, h2p).astype(jnp.float32),
        _pad2(w3, h2p, outp).astype(jnp.bfloat16),
        _pad2(b3, 1, outp).astype(jnp.float32),
    )
    return padded, out_features


@functools.partial(jax.jit, static_argnums=(2,))
def ann_forward_prepared(x, padded_params, out_features):
    """Forward pass using pre-padded bf16 weights. x: [B, in_features] f32."""
    w1p, b1p, w2p, b2p, w3p, b3p = padded_params
    batch, in_features = x.shape
    h1p, h2p, outp = w1p.shape[1], w2p.shape[1], w3p.shape[1]

    tb = _pick_batch_tile(batch)
    grid = (pl.cdiv(batch, tb),)

    resident = lambda i: (0, 0)  # weights/biases: DMA'd once, resident in VMEM

    flops = 2 * batch * (in_features * h1p + h1p * h2p + h2p * outp)
    bytes_accessed = (
        batch * in_features * 4                                   # x (f32, read once)
        + (w1p.size + w2p.size + w3p.size) * 2                    # bf16 weights
        + (b1p.size + b2p.size + b3p.size) * 4                    # f32 biases
        + batch * out_features * 4)                               # narrow f32 output

    out = pl.pallas_call(
        functools.partial(_ann_kernel, num_valid_out=out_features),
        out_shape=jax.ShapeDtypeStruct((batch, out_features), jnp.float32),
        grid_spec=pltpu.PrefetchScalarGridSpec(
            num_scalar_prefetch=0,
            grid=grid,
            in_specs=[
                pl.BlockSpec((tb, in_features), lambda i: (i, 0)),  # x tile (f32)
                pl.BlockSpec((in_features, h1p), resident),
                pl.BlockSpec((1, h1p), resident),
                pl.BlockSpec((h1p, h2p), resident),
                pl.BlockSpec((1, h2p), resident),
                pl.BlockSpec((h2p, outp), resident),
                pl.BlockSpec((1, outp), resident),
            ],
            out_specs=pl.BlockSpec((tb, out_features), lambda i: (i, 0)),
        ),
        compiler_params=pltpu.CompilerParams(
            dimension_semantics=("parallel",),  # shard batch tiles across TCs on v7x
        ),
        cost_estimate=pl.CostEstimate(
            flops=flops,
            transcendentals=batch * outp,
            bytes_accessed=bytes_accessed),
    )(x, w1p, b1p, w2p, b2p, w3p, b3p)

    return out


def ann_forward(x, w1, b1, w2, b2, w3, b3):
    """One-shot convenience wrapper. For repeated calls, use prepare_params once."""
    padded, out_features = prepare_params(w1, b1, w2, b2, w3, b3)
    return ann_forward_prepared(x, padded, out_features)


def init_params(key, in_features=784, out_features=10):
    """Deterministic init matching nn.Linear shapes (Kaiming-uniform-ish)."""
    dims = [(in_features, 120), (120, 84), (84, out_features)]
    params = []
    for i, (fan_in, fan_out) in enumerate(dims):
        kw, kb, key = jax.random.split(jax.random.fold_in(key, i), 3)
        bound = 1.0 / jnp.sqrt(fan_in)
        # PyTorch stores W as [out, in]; we store the transpose [in, out].
        w = jax.random.uniform(kw, (fan_in, fan_out), jnp.float32, -bound, bound)
        b = jax.random.uniform(kb, (1, fan_out), jnp.float32, -bound, bound)
        params += [w, b]
    return params


if __name__ == "__main__":
    key = jax.random.PRNGKey(0)
    kx, kp = jax.random.split(key)

    batch, in_features, out_features = 8, 784, 10
    x = jax.random.normal(kx, (batch, in_features), jnp.float32)
    w1, b1, w2, b2, w3, b3 = init_params(kp, in_features, out_features)

    padded_params, nout = prepare_params(w1, b1, w2, b2, w3, b3)
    out = ann_forward_prepared(x, padded_params, nout)
    jax.block_until_ready(out)

    # sanity: shape + softmax rows sum to 1 (exact reciprocal in the epilogue)
    assert out.shape == (batch, out_features)
    assert jnp.allclose(jnp.sum(out, axis=1), 1.0, atol=1e-3)

    # reference matching the kernel's bf16-input / f32-accumulate arithmetic
    def ref_bf16(x):
        xb = x.astype(jnp.bfloat16)
        h1 = jnp.maximum(
            jnp.dot(xb, w1.astype(jnp.bfloat16), preferred_element_type=jnp.float32) + b1,
            0.0).astype(jnp.bfloat16)
        h2 = jnp.maximum(
            jnp.dot(h1, w2.astype(jnp.bfloat16), preferred_element_type=jnp.float32) + b2,
            0.0).astype(jnp.bfloat16)
        logits = jnp.dot(h2, w3.astype(jnp.bfloat16), preferred_element_type=jnp.float32) + b3
        return jax.nn.softmax(logits, axis=1)

    # full f32 reference (original module semantics), looser tolerance for bf16
    def ref_f32(x):
        h1 = jnp.maximum(x @ w1 + b1, 0.0)
        h2 = jnp.maximum(h1 @ w2 + b2, 0.0)
        return jax.nn.softmax(h2 @ w3 + b3, axis=1)

    assert jnp.allclose(out, ref_bf16(x), atol=2e-2)
    assert jnp.allclose(out, ref_f32(x), atol=5e-2)

    print("KERNEL_OK")
</pallas_src>

<mosaic_0001>
module attributes {stable_mosaic.version = 11 : i64} {
  func.func @_ann_kernel(%arg0: i32, %arg1: memref<8x784xf32, #tpu.memory_space<vmem>>, %arg2: memref<784x128xbf16, #tpu.memory_space<vmem>>, %arg3: memref<1x128xf32, #tpu.memory_space<vmem>>, %arg4: memref<128x128xbf16, #tpu.memory_space<vmem>>, %arg5: memref<1x128xf32, #tpu.memory_space<vmem>>, %arg6: memref<128x128xbf16, #tpu.memory_space<vmem>>, %arg7: memref<1x128xf32, #tpu.memory_space<vmem>>, %arg8: memref<8x10xf32, #tpu.memory_space<vmem>>) attributes {dimension_semantics = [#tpu.dimension_semantics<parallel>], iteration_bounds = array<i64: 1>, scalar_prefetch = 0 : i64, scratch_operands = 0 : i64, tpu.core_type = #tpu.core_type<tc>, window_params = [{transform_indices = @transform_0, window_bounds = array<i64: 8, 784>}, {pipeline_mode = #tpu.pipeline_mode<synchronous>, transform_indices = @transform_1, window_bounds = array<i64: 784, 128>}, {pipeline_mode = #tpu.pipeline_mode<synchronous>, transform_indices = @transform_2, window_bounds = array<i64: 1, 128>}, {pipeline_mode = #tpu.pipeline_mode<synchronous>, transform_indices = @transform_3, window_bounds = array<i64: 128, 128>}, {pipeline_mode = #tpu.pipeline_mode<synchronous>, transform_indices = @transform_4, window_bounds = array<i64: 1, 128>}, {pipeline_mode = #tpu.pipeline_mode<synchronous>, transform_indices = @transform_5, window_bounds = array<i64: 128, 128>}, {pipeline_mode = #tpu.pipeline_mode<synchronous>, transform_indices = @transform_6, window_bounds = array<i64: 1, 128>}, {transform_indices = @transform_7, window_bounds = array<i64: 8, 10>}]} {
    %c0 = arith.constant 0 : index
    %c0_0 = arith.constant 0 : index
    %0 = vector.load %arg1[%c0, %c0_0] : memref<8x784xf32, #tpu.memory_space<vmem>>, vector<8x784xf32>
    %1 = arith.truncf %0 : vector<8x784xf32> to vector<8x784xbf16>
    %c0_1 = arith.constant 0 : index
    %c0_2 = arith.constant 0 : index
    %2 = vector.load %arg2[%c0_1, %c0_2] : memref<784x128xbf16, #tpu.memory_space<vmem>>, vector<784x128xbf16>
    %cst = arith.constant dense<0.000000e+00> : vector<8x128xf32>
    %3 = tpu.matmul %1, %2, %cst {dimension_numbers = #tpu.dot_dimension_numbers<[1], [0], [0], [1], [0, 0, 1, 1], [], []>} : vector<8x784xbf16>, vector<784x128xbf16>, vector<8x128xf32> -> vector<8x128xf32>
    %c0_3 = arith.constant 0 : index
    %c0_4 = arith.constant 0 : index
    %4 = vector.load %arg3[%c0_3, %c0_4] : memref<1x128xf32, #tpu.memory_space<vmem>>, vector<1x128xf32>
    %5 = vector.broadcast %4 : vector<1x128xf32> to vector<8x128xf32>
    %6 = arith.addf %3, %5 : vector<8x128xf32>
    %cst_5 = arith.constant 0.000000e+00 : f32
    %7 = vector.broadcast %cst_5 : f32 to vector<8x128xf32>
    %8 = arith.maximumf %6, %7 : vector<8x128xf32>
    %9 = arith.truncf %8 : vector<8x128xf32> to vector<8x128xbf16>
    %c0_6 = arith.constant 0 : index
    %c0_7 = arith.constant 0 : index
    %10 = vector.load %arg4[%c0_6, %c0_7] : memref<128x128xbf16, #tpu.memory_space<vmem>>, vector<128x128xbf16>
    %cst_8 = arith.constant dense<0.000000e+00> : vector<8x128xf32>
    %11 = tpu.matmul %9, %10, %cst_8 {dimension_numbers = #tpu.dot_dimension_numbers<[1], [0], [0], [1], [0, 0, 1, 1], [], []>} : vector<8x128xbf16>, vector<128x128xbf16>, vector<8x128xf32> -> vector<8x128xf32>
    %c0_9 = arith.constant 0 : index
    %c0_10 = arith.constant 0 : index
    %12 = vector.load %arg5[%c0_9, %c0_10] : memref<1x128xf32, #tpu.memory_space<vmem>>, vector<1x128xf32>
    %13 = vector.broadcast %12 : vector<1x128xf32> to vector<8x128xf32>
    %14 = arith.addf %11, %13 : vector<8x128xf32>
    %cst_11 = arith.constant 0.000000e+00 : f32
    %15 = vector.broadcast %cst_11 : f32 to vector<8x128xf32>
    %16 = arith.maximumf %14, %15 : vector<8x128xf32>
    %17 = arith.truncf %16 : vector<8x128xf32> to vector<8x128xbf16>
    %c0_12 = arith.constant 0 : index
    %c0_13 = arith.constant 0 : index
    %18 = vector.load %arg6[%c0_12, %c0_13] : memref<128x128xbf16, #tpu.memory_space<vmem>>, vector<128x128xbf16>
    %cst_14 = arith.constant dense<0.000000e+00> : vector<8x128xf32>
    %19 = tpu.matmul %17, %18, %cst_14 {dimension_numbers = #tpu.dot_dimension_numbers<[1], [0], [0], [1], [0, 0, 1, 1], [], []>} : vector<8x128xbf16>, vector<128x128xbf16>, vector<8x128xf32> -> vector<8x128xf32>
    %c0_15 = arith.constant 0 : index
    %c0_16 = arith.constant 0 : index
    %20 = vector.load %arg7[%c0_15, %c0_16] : memref<1x128xf32, #tpu.memory_space<vmem>>, vector<1x128xf32>
    %21 = vector.broadcast %20 : vector<1x128xf32> to vector<8x128xf32>
    %22 = arith.addf %19, %21 : vector<8x128xf32>
    %23 = tpu.iota {dimensions = array<i32: 1>} : vector<8x128xi32>
    %c10_i32 = arith.constant 10 : i32
    %24 = vector.broadcast %c10_i32 : i32 to vector<8x128xi32>
    %25 = arith.cmpi slt, %23, %24 : vector<8x128xi32>
    %cst_17 = arith.constant -1.000000e+30 : f32
    %26 = vector.broadcast %cst_17 : f32 to vector<8x128xf32>
    %27 = arith.select %25, %22, %26 : vector<8x128xi1>, vector<8x128xf32>
    %cst_18 = arith.constant dense<0xFF800000> : vector<8xf32>
    %28 = vector.multi_reduction <maximumf>, %27, %cst_18 [1] : vector<8x128xf32> to vector<8xf32>
    %29 = vector.shape_cast %28 : vector<8xf32> to vector<8x1xf32>
    %30 = vector.broadcast %29 : vector<8x1xf32> to vector<8x128xf32>
    %31 = arith.subf %27, %30 : vector<8x128xf32>
    %32 = math.exp %31 : vector<8x128xf32>
    %cst_19 = arith.constant dense<0.000000e+00> : vector<8xf32>
    %33 = vector.multi_reduction <add>, %32, %cst_19 [1] : vector<8x128xf32> to vector<8xf32>
    %34 = vector.shape_cast %33 : vector<8xf32> to vector<8x1xf32>
    %35 = tpu.reciprocal %34 : vector<8x1xf32> -> vector<8x1xf32>
    %36 = vector.broadcast %35 : vector<8x1xf32> to vector<8x128xf32>
    %37 = arith.mulf %32, %36 : vector<8x128xf32>
    %38 = vector.extract_strided_slice %37 {offsets = [0, 0], sizes = [8, 10], strides = [1, 1]} : vector<8x128xf32> to vector<8x10xf32>
    %c0_20 = arith.constant 0 : index
    %c0_21 = arith.constant 0 : index
    %39 = vector.load %arg8[%c0_20, %c0_21] : memref<8x10xf32, #tpu.memory_space<vmem>>, vector<8x10xf32>
    tpu.vector_store %arg8[%c0_20, %c0_21], %38 {strides = array<i32>} : memref<8x10xf32, #tpu.memory_space<vmem>>, vector<8x10xf32>,
    return
  }
  func.func @transform_0(%arg0: i32) -> (i32, i32) {
    %c0_i32 = arith.constant 0 : i32
    %c0_i32_0 = arith.constant 0 : i32
    return %arg0, %c0_i32 : i32, i32
  }
  func.func @transform_1(%arg0: i32) -> (i32, i32) {
    %c0_i32 = arith.constant 0 : i32
    %c0_i32_0 = arith.constant 0 : i32
    %c0_i32_1 = arith.constant 0 : i32
    return %c0_i32, %c0_i32_0 : i32, i32
  }
  func.func @transform_2(%arg0: i32) -> (i32, i32) {
    %c0_i32 = arith.constant 0 : i32
    %c0_i32_0 = arith.constant 0 : i32
    %c0_i32_1 = arith.constant 0 : i32
    return %c0_i32, %c0_i32_0 : i32, i32
  }
  func.func @transform_3(%arg0: i32) -> (i32, i32) {
    %c0_i32 = arith.constant 0 : i32
    %c0_i32_0 = arith.constant 0 : i32
    %c0_i32_1 = arith.constant 0 : i32
    return %c0_i32, %c0_i32_0 : i32, i32
  }
  func.func @transform_4(%arg0: i32) -> (i32, i32) {
    %c0_i32 = arith.constant 0 : i32
    %c0_i32_0 = arith.constant 0 : i32
    %c0_i32_1 = arith.constant 0 : i32
    return %c0_i32, %c0_i32_0 : i32, i32
  }
  func.func @transform_5(%arg0: i32) -> (i32, i32) {
    %c0_i32 = arith.constant 0 : i32
    %c0_i32_0 = arith.constant 0 : i32
    %c0_i32_1 = arith.constant 0 : i32
    return %c0_i32, %c0_i32_0 : i32, i32
  }
  func.func @transform_6(%arg0: i32) -> (i32, i32) {
    %c0_i32 = arith.constant 0 : i32
    %c0_i32_0 = arith.constant 0 : i32
    %c0_i32_1 = arith.constant 0 : i32
    return %c0_i32, %c0_i32_0 : i32, i32
  }
  func.func @transform_7(%arg0: i32) -> (i32, i32) {
    %c0_i32 = arith.constant 0 : i32
    %c0_i32_0 = arith.constant 0 : i32
    return %arg0, %c0_i32 : i32, i32
  }
}

</mosaic_0001>

<bundles_post_ra>
// kernel: ann_forward_prepared.1
= control target key start
LH: loop header
LB: loop body
LE: loop exit
PB: predicated region body
PF: predicated region fallthrough
CT: control target
= control target key end

     0   :  { %12 = vsyncpa [#allocation3], 0  ;;  %s1463_s0 = inlined_call_operand.hbm [shape: f32[8,784], index: 0, kind: input, shape index: {}]   ;;  %s1464_s1 = inlined_call_operand.hbm [shape: bf16[784,128], index: 1, kind: input, shape index: {}]   ;;  %s1465_s2 = inlined_call_operand.vmem [shape: f32[1,128], index: 2, kind: input, shape index: {}]   ;;  %s1466_s3 = inlined_call_operand.hbm [shape: bf16[128,128], index: 3, kind: input, shape index: {}]   ;;  %s1467_s4 = inlined_call_operand.vmem [shape: f32[1,128], index: 4, kind: input, shape index: {}]   ;;  %s1468_s5 = inlined_call_operand.hbm [shape: bf16[128,128], index: 5, kind: input, shape index: {}]   ;;  %s1469_s6 = inlined_call_operand.vmem [shape: f32[1,128], index: 6, kind: input, shape index: {}]   ;;  %s1470_s7 = inlined_call_operand.hbm [shape: f32[8,10], index: 7, kind: output, shape index: {}]  }
   0x1   :  { %13 = vsyncpa [#allocation6], 0 }
   0x2   :  { %14 = vsyncpa [#allocation9], 0 }
   0x3   :  { %15 = vsyncpa [#allocation4], 0  ;;  %s1313_s24 = smov [#allocation5]   ;;  %s1195_s28 = scalar_lea.hbm %s1464_s1, 6272 }
   0x4   :  { %s31_s25 = sshll.u32 %s1313_s24, 4  ;;  %p1196_p0 = scmp.ne.s32.totalorder %s1464_s1, %s1195_s28  ;;  %s32_s25 = int_to_ptr.vmem [resolvable:$true] %s31_s25 }
   0x5   :  { %p1199_p1 = scmp.lt.u32.totalorder %s1195_s28, %s1464_s1 }
   0x7   :  { %p1201_p2 = pnand %p1199_p1, %p1196_p0 }
   0x9   :  { %1204 = shalt.err (!%p1201_p2)
}
   0xa   :  { %s1205_s10 = scalar_lea.vmem %s32_s25, 6272  ;;  %p1210_p4 = scmp.lt.s32.totalorder %s32_s25, %s32_s25 }
   0xb   :  { %p1206_p3 = scmp.ne.s32.totalorder %s32_s25, %s1205_s10  ;;  %p1211_p5 = scmp.lt.s32.totalorder %s1205_s10, %s1205_s10 }
   0xd   :  { %p1212_p6 = por %p1211_p5, %p1210_p4 }
   0xf   :  { %p1213_p7 = pnand %p1212_p6, %p1206_p3 }
  0x11   :  { %1216 = shalt.err (!%p1213_p7)
}
  0x12   :  { %s1314_s11 = smov 64   ;;  %s1315_s12 = smov 4  }
  0x13   :  { %37 = dma.hbm_to_vmem [thread:$0]  %s1464_s1, 6272, %s32_s25, [#allocation6], %s1314_s11, %s1314_s11, %s1315_s12  }
  0x14   :  { %s1316_s15 = smov [#allocation2]   ;;  %s1317_s17 = smov [#allocation7]  }
  0x15   :  { %s22_s16 = sshll.u32 %s1316_s15, 4  ;;  %s45_s18 = sshll.u32 %s1317_s17, 4  ;;  %s23_s16 = int_to_ptr.vmem [resolvable:$true] %s22_s16  ;;  %s46_s18 = int_to_ptr.vmem [resolvable:$true] %s45_s18 }
  0x16   :  { %s1217_s21 = scalar_lea.hbm %s1463_s0, 896 }
  0x17   :  { %p1218_p8 = scmp.ne.s32.totalorder %s1463_s0, %s1217_s21  ;;  %p1221_p9 = scmp.lt.u32.totalorder %s1217_s21, %s1463_s0 }
  0x19   :  { %p1223_p10 = pnand %p1221_p9, %p1218_p8 }
  0x1b   :  { %1226 = shalt.err (!%p1223_p10)
}
  0x1c   :  { %s1227_s1 = scalar_lea.vmem %s23_s16, 896  ;;  %p1232_p12 = scmp.lt.s32.totalorder %s23_s16, %s23_s16 }
  0x1d   :  { %p1228_p11 = scmp.ne.s32.totalorder %s23_s16, %s1227_s1  ;;  %p1233_p13 = scmp.lt.s32.totalorder %s1227_s1, %s1227_s1 }
  0x1f   :  { %p1234_p0 = por %p1233_p13, %p1232_p12 }
  0x21   :  { %p1235_p1 = pnand %p1234_p0, %p1228_p11 }
  0x23   :  { %1238 = shalt.err (!%p1235_p1)
}
  0x24   :  { %25 = dma.hbm_to_vmem [thread:$0]  %s1463_s0, 896, %s23_s16, [#allocation3]  }
  0x25   :  { %s1239_s30 = scalar_lea.hbm %s1466_s3, 1024 }
  0x26   :  { %p1240_p2 = scmp.ne.s32.totalorder %s1466_s3, %s1239_s30  ;;  %p1243_p3 = scmp.lt.u32.totalorder %s1239_s30, %s1466_s3 }
  0x28   :  { %p1245_p4 = pnand %p1243_p3, %p1240_p2 }
  0x2a   :  { %1248 = shalt.err (!%p1245_p4)
}
  0x2b   :  { %s1249_s14 = scalar_lea.vmem %s46_s18, 1024  ;;  %p1254_p6 = scmp.lt.s32.totalorder %s46_s18, %s46_s18 }
  0x2c   :  { %p1250_p5 = scmp.ne.s32.totalorder %s46_s18, %s1249_s14  ;;  %p1255_p7 = scmp.lt.s32.totalorder %s1249_s14, %s1249_s14 }
  0x2e   :  { %p1256_p8 = por %p1255_p7, %p1254_p6 }
  0x30   :  { %p1257_p9 = pnand %p1256_p8, %p1250_p5 }
  0x32   :  { %1260 = shalt.err (!%p1257_p9)
}
  0x33   :  { %51 = dma.hbm_to_vmem [thread:$0]  %s1466_s3, 1024, %s46_s18, [#allocation6], %s1314_s11, %s1314_s11, %s1315_s12  }
  0x34   :  { %s1318_s16 = smov [#allocation8]   ;;  %s1261_s21 = scalar_lea.hbm %s1468_s5, 1024 }
  0x35   :  { %s59_s17 = sshll.u32 %s1318_s16, 4  ;;  %p1262_p10 = scmp.ne.s32.totalorder %s1468_s5, %s1261_s21  ;;  %s60_s17 = int_to_ptr.vmem [resolvable:$true] %s59_s17 }
  0x36   :  { %p1265_p11 = scmp.lt.u32.totalorder %s1261_s21, %s1468_s5 }
  0x38   :  { %p1267_p12 = pnand %p1265_p11, %p1262_p10 }
  0x3a   :  { %1270 = shalt.err (!%p1267_p12)
}
  0x3b   :  { %s1271_s1 = scalar_lea.vmem %s60_s17, 1024  ;;  %p1276_p0 = scmp.lt.s32.totalorder %s60_s17, %s60_s17 }
  0x3c   :  { %p1272_p13 = scmp.ne.s32.totalorder %s60_s17, %s1271_s1  ;;  %p1277_p1 = scmp.lt.s32.totalorder %s1271_s1, %s1271_s1 }
  0x3e   :  { %p1278_p2 = por %p1277_p1, %p1276_p0 }
  0x40   :  { %p1279_p3 = pnand %p1278_p2, %p1272_p13 }
  0x42   :  { %1282 = shalt.err (!%p1279_p3)
}
  0x43   :  { %65 = dma.hbm_to_vmem [thread:$0]  %s1468_s5, 1024, %s60_s17, [#allocation9], %s1314_s11, %s1314_s11, %s1315_s12  }
  0x44   :  { %1305 = dma.done.wait [#allocation3], 896  }
  0x45   :  { %1306 = vsyncadd [#allocation3], 4294966400 }
  0x46   :  { %1307 = dma.done.wait [#allocation6], 7296  }
  0x47   :  { %1308 = vsyncadd [#allocation6], 4294960000 }
  0x48   :  { %1309 = dma.done.wait [#allocation9], 1024  }
  0x49   :  { %1310 = vsyncadd [#allocation9], 4294966272  ;;  %v1126_v0 = vld [vmem:[#allocation5 + $0x40] sm:$0xff]   ;;  %v1130_v4 = vld [vmem:[#allocation5 + $0x48] sm:$0xff]   ;;  %v1319_v44 = vmov 0.0   ;;  %vm1320_vm0 = vmmov 0  }
  0x4a   :  { %v1127_v1 = vld [vmem:[#allocation5] sm:$0xff]   ;;  %985 = vmatprep.subr.bf16.mxu0 %v1126_v0  ;;  %v1131_v5 = vld [vmem:[#allocation5 + $0x8] sm:$0xff]   ;;  %v1134_v8 = vld [vmem:[#allocation5 + $0x50] sm:$0xff]   ;;  %vm494_vm1 = vcmask 130048   ;;  %vm897_vm3 = vcmask 80896  }
  0x4b   :  { %v1128_v2 = vld [vmem:[#allocation5 + $0xc0] sm:$0xff]   ;;  %986 = vmatpush3.bf16.msra.mxu0 %v1127_v1  ;;  %v1132_v6 = vld [vmem:[#allocation5 + $0xc8] sm:$0xff]   ;;  %v1135_v9 = vld [vmem:[#allocation5 + $0x10] sm:$0xff]  }
  0x4c   :  { %v1129_v3 = vld [vmem:[#allocation5 + $0x80] sm:$0xff]   ;;  %1007 = vmatprep.subr.bf16.mxu1 %v1128_v2  ;;  %987 = vmatprep.subr.bf16.mxu0 %v1130_v4  ;;  %v1133_v7 = vld [vmem:[#allocation5 + $0x88] sm:$0xff]   ;;  %v1136_v10 = vld [vmem:[#allocation5 + $0xd0] sm:$0xff]  }
  0x4d   :  { %1008 = vmatpush3.bf16.msra.mxu1 %v1129_v3  ;;  %v1137_v11 = vld [vmem:[#allocation5 + $0x90] sm:$0xff]   ;;  %v1138_v12 = vld [vmem:[#allocation5 + $0x58] sm:$0xff]   ;;  %v1142_v16 = vld [vmem:[#allocation5 + $0x60] sm:$0xff]  }
  0x4e   :  { %1009 = vmatprep.subr.bf16.mxu1 %v1132_v6  ;;  %v1139_v13 = vld [vmem:[#allocation5 + $0x18] sm:$0xff]   ;;  %v1143_v17 = vld [vmem:[#allocation5 + $0x20] sm:$0xff]   ;;  %v1146_v20 = vld [vmem:[#allocation5 + $0x68] sm:$0xff]  }
  0x4f   :  { %988 = vmatpush3.bf16.msra.mxu0 %v1131_v5  ;;  %v1140_v14 = vld [vmem:[#allocation5 + $0xd8] sm:$0xff]   ;;  %v1144_v18 = vld [vmem:[#allocation5 + $0xe0] sm:$0xff]   ;;  %v1147_v21 = vld [vmem:[#allocation5 + $0x28] sm:$0xff]  }
  0x50   :  { %989 = vmatprep.subr.bf16.mxu0 %v1134_v8  ;;  %v1141_v15 = vld [vmem:[#allocation5 + $0x98] sm:$0xff]   ;;  %v1145_v19 = vld [vmem:[#allocation5 + $0xa0] sm:$0xff]   ;;  %v1148_v22 = vld [vmem:[#allocation5 + $0xe8] sm:$0xff]  }
  0x51   :  { %1010 = vmatpush3.bf16.msra.mxu1 %v1133_v7  ;;  %v1149_v23 = vld [vmem:[#allocation5 + $0xa8] sm:$0xff]   ;;  %v1150_v24 = vld [vmem:[#allocation5 + $0x70] sm:$0xff]   ;;  %v1154_v28 = vld [vmem:[#allocation5 + $0x78] sm:$0xff]  }
  0x52   :  { %1011 = vmatprep.subr.bf16.mxu1 %v1136_v10  ;;  %v1151_v25 = vld [vmem:[#allocation5 + $0x30] sm:$0xff]   ;;  %v1155_v29 = vld [vmem:[#allocation5 + $0x38] sm:$0xff]   ;;  %v81_v34 = vld [vmem:[#allocation2] sm:$0xff] }
  0x53   :  { %990 = vmatpush3.bf16.msra.mxu0 %v1135_v9  ;;  %v1152_v26 = vld [vmem:[#allocation5 + $0xf0] sm:$0xff]   ;;  %v1156_v30 = vld [vmem:[#allocation5 + $0xf8] sm:$0xff]   ;;  %v88_v35 = vpack.c.bf16 %v81_v34, %v81_v34  ;;  %v1158_v36 = vld [vmem:[#allocation5 + $0x140] sm:$0xff]  }
  0x54   :  { %991 = vmatprep.subr.bf16.mxu0 %v1138_v12  ;;  %v1153_v27 = vld [vmem:[#allocation5 + $0xb0] sm:$0xff]   ;;  %v1157_v33 = vld [vmem:[#allocation5 + $0xb8] sm:$0xff]   ;;  %v84_v37 = vld [vmem:[#allocation2 + $0x18] sm:$0xff] }
  0x55   :  { %1012 = vmatpush3.bf16.msra.mxu1 %v1137_v11  ;;  %v82_v31 = vld [vmem:[#allocation2 + $0x8] sm:$0xff]  ;;  %v91_v38 = vpack.c.bf16 %v84_v37, %v84_v37  ;;  %v1159_v39 = vld [vmem:[#allocation5 + $0x100] sm:$0xff]   ;;  %v83_v40 = vld [vmem:[#allocation2 + $0x10] sm:$0xff] }
  0x56   :  { %1013 = vmatprep.subr.bf16.mxu1 %v1140_v14  ;;  %v89_v32 = vpack.c.bf16 %v82_v31, %v82_v31  ;;  %v90_v41 = vpack.c.bf16 %v83_v40, %v83_v40  ;;  %v1160_v42 = vld [vmem:[#allocation5 + $0x148] sm:$0xff]   ;;  %v1162_v45 = vld [vmem:[#allocation5 + $0x150] sm:$0xff]   ;;  %v1164_v47 = vld [vmem:[#allocation5 + $0x158] sm:$0xff]  }
  0x57   :  { %992 = vmatpush3.bf16.msra.mxu0 %v1139_v13  ;;  %570 = vmatprep.mubr.bf16.mxu1 %v91_v38  ;;  %v1161_v43 = vld [vmem:[#allocation5 + $0x108] sm:$0xff]   ;;  %v1163_v46 = vld [vmem:[#allocation5 + $0x110] sm:$0xff]   ;;  %v1165_v48 = vld [vmem:[#allocation5 + $0x118] sm:$0xff]  }
  0x58   :  { %993 = vmatprep.subr.bf16.mxu0 %v1142_v16  ;;  %530 = vmatprep.mubr.bf16.mxu0 %v89_v32  ;;  %v1166_v49 = vld [vmem:[#allocation5 + $0x160] sm:$0xff]   ;;  %v1168_v51 = vld [vmem:[#allocation5 + $0x168] sm:$0xff]   ;;  %v86_v54 = vld [vmem:[#allocation2 + $0x28] sm:$0xff] }
  0x59   :  { %1014 = vmatpush3.bf16.msra.mxu1 %v1141_v15  ;;  %v1167_v50 = vld [vmem:[#allocation5 + $0x120] sm:$0xff]   ;;  %v1169_v52 = vld [vmem:[#allocation5 + $0x128] sm:$0xff]   ;;  %v1170_v55 = vld [vmem:[#allocation5 + $0x170] sm:$0xff]   ;;  %v93_v56 = vpack.c.bf16 %v86_v54, %v86_v54 }
  0x5a   :  { %1015 = vmatprep.subr.bf16.mxu1 %v1144_v18  ;;  %v1174_v53 = vld [vmem:[#allocation5 + $0x180] sm:$0xff]   ;;  %v87_v57 = vld [vmem:[#allocation2 + $0x30] sm:$0xff]  ;;  %v1171_v59 = vld [vmem:[#allocation5 + $0x130] sm:$0xff]  }
  0x5b   :  { %994 = vmatpush3.bf16.msra.mxu0 %v1143_v17  ;;  %v94_v58 = vpack.c.bf16 %v87_v57, %v87_v57  ;;  %v1172_v60 = vld [vmem:[#allocation5 + $0x178] sm:$0xff]   ;;  %v85_v62 = vld [vmem:[#allocation2 + $0x20] sm:$0xff]  ;;  %v1176_v1 = vld [vmem:[#allocation7 + $0x8] sm:$0xff]  }
  0x5c   :  { %995 = vmatprep.subr.bf16.mxu0 %v1146_v20  ;;  %v1173_v61 = vld [vmem:[#allocation5 + $0x138] sm:$0xff]   ;;  %v92_v63 = vpack.c.bf16 %v85_v62, %v85_v62  ;;  %v1175_v0 = vld [vmem:[#allocation7] sm:$0xff]   ;;  %v1178_v3 = vld [vmem:[#allocation7 + $0x18] sm:$0xff]  }
  0x5d   :  { %1016 = vmatpush3.bf16.msra.mxu1 %v1145_v19  ;;  %v1177_v2 = vld [vmem:[#allocation7 + $0x10] sm:$0xff]   ;;  %v1179_v4 = vld [vmem:[#allocation7 + $0x20] sm:$0xff]   ;;  %v1180_v5 = vld [vmem:[#allocation7 + $0x28] sm:$0xff]  }
  0x5e   :  { %1017 = vmatprep.subr.bf16.mxu1 %v1148_v22  ;;  %v1181_v6 = vld [vmem:[#allocation7 + $0x30] sm:$0xff]   ;;  %v1182_v7 = vld [vmem:[#allocation7 + $0x38] sm:$0xff]   ;;  %v1183_v8 = vld [vmem:[#allocation8] sm:$0xff]  }
  0x5f   :  { %996 = vmatpush3.bf16.msra.mxu0 %v1147_v21  ;;  %v1184_v9 = vld [vmem:[#allocation8 + $0x8] sm:$0xff]   ;;  %v1185_v10 = vld [vmem:[#allocation8 + $0x10] sm:$0xff]   ;;  %v1186_v11 = vld [vmem:[#allocation8 + $0x18] sm:$0xff]  }
  0x60   :  { %997 = vmatprep.subr.bf16.mxu0 %v1150_v24  ;;  %v1187_v12 = vld [vmem:[#allocation8 + $0x20] sm:$0xff]   ;;  %v1188_v13 = vld [vmem:[#allocation8 + $0x28] sm:$0xff]   ;;  %v1189_v40 = vld [vmem:[#allocation8 + $0x30] sm:$0xff]  }
  0x61   :  { %1018 = vmatpush3.bf16.msra.mxu1 %v1149_v23  ;;  %v916_v15 = vld [vmem:[%s1465_s2] ss:$0 sm:$0xff] }
  0x62   :  { %1019 = vmatprep.subr.bf16.mxu1 %v1152_v26 }
  0x63   :  { %998 = vmatpush3.bf16.msra.mxu0 %v1151_v25 }
  0x64   :  { %999 = vmatprep.subr.bf16.mxu0 %v1154_v28 }
  0x65   :  { %1020 = vmatpush3.bf16.msra.mxu1 %v1153_v27 }
  0x66   :  { %1021 = vmatprep.subr.bf16.mxu1 %v1156_v30 }
  0x67   :  { %1000 = vmatpush3.bf16.msra.mxu0 %v1155_v29 }
  0x68   :  { %1029 = vmatprep.subr.bf16.mxu0 %v1158_v36 }
  0x69   :  { %1022 = vmatpush3.bf16.msra.mxu1 %v1157_v33 }
  0x6a   :  { %531 = vmatmul.mubr.bf16.vlgmr.msra.gmra.mrb[0].mxu0 %v88_v35  ;;  %1071 = vmatprep.subr.bf16.mxu1 %v1319_v44 }
  0x6b   :  { %1030 = vmatpush3.bf16.msra.mxu0 %v1159_v39  ;;  %610 = vmatprep.mubr.bf16.mxu0 %v93_v56 }
  0x6c   :  { %571 = vmatmul.mubr.bf16.vlgmr.msra.gmra.mrb[0].mxu1 %v90_v41  ;;  %1031 = vmatprep.subr.bf16.mxu0 %v1160_v42  ;;  %v1190_v41 = vld [vmem:[#allocation8 + $0x38] sm:$0xff]   ;;  %v967_v42 = vld [vmem:[%s1467_s4] ss:$0 sm:$0xff]  ;;  %s1321_s4 = smov [#allocation10]  }
  0x6d   :  { %1073 = vmatprep.mubr.msk.bf16.mxu1 %vm1320_vm0, %v1319_v44  ;;  %1072 = vmatpush3.bf16.msra.mxu1 %v1174_v53  ;;  %s905_s28 = sshll.u32 %s1321_s4, 4  ;;  %s906_s28 = int_to_ptr.vmem [resolvable:$true] %s905_s28 }
  0x6e   :  { %1077 = vmatprep.subr.bf16.mxu1 %v1319_v44  ;;  %p1288_p5 = scmp.lt.s32.totalorder %s906_s28, %s906_s28 }
  0x6f   :  { %1032 = vmatpush3.bf16.msra.mxu0 %v1161_v43 }
  0x70   :  { %1033 = vmatprep.subr.bf16.mxu0 %v1162_v45 }
  0x73   :  { %1034 = vmatpush3.bf16.msra.mxu0 %v1163_v46 }
  0x74   :  { %1035 = vmatprep.subr.bf16.mxu0 %v1164_v47  ;;  %1074 = vmatmul.mubr.msk.bf16.vlgmr.msra.gmra.mrb[4].mxu1 %vm494_vm1, %v94_v58 }
  0x75   :  { %1093 = vmatprep.mubr.msk.bf16.mxu1 %vm1320_vm0, %v1319_v44  ;;  %1078 = vmatpush3.bf16.msra.mxu1 %v1175_v0 }
  0x76   :  { %1079 = vmatprep.subr.bf16.mxu1 %v1319_v44 }
  0x77   :  { %1036 = vmatpush3.bf16.msra.mxu0 %v1165_v48 }
  0x78   :  { %1037 = vmatprep.subr.bf16.mxu0 %v1166_v49 }
  0x79   :  { %1080 = vmatpush3.bf16.msra.mxu1 %v1176_v1 }
  0x7a   :  { %1081 = vmatprep.subr.bf16.mxu1 %v1319_v44 }
  0x7b   :  { %1038 = vmatpush3.bf16.msra.mxu0 %v1167_v50 }
  0x7c   :  { %1039 = vmatprep.subr.bf16.mxu0 %v1168_v51  ;;  %v884_v51 = vlaneseq }
  0x7d   :  { %1082 = vmatpush3.bf16.msra.mxu1 %v1177_v2 }
  0x7e   :  { %1083 = vmatprep.subr.bf16.mxu1 %v1319_v44 }
  0x7f   :  { %1040 = vmatpush3.bf16.msra.mxu0 %v1169_v52  ;;  %v885_v52 = vand.u32 127, %v884_v51 }
  0x80   :  { %1041 = vmatprep.subr.bf16.mxu0 %v1170_v55 }
  0x81   :  { %1084 = vmatpush3.bf16.msra.mxu1 %v1178_v3  ;;  %vm886_vm2 = vcmp.lt.s32.totalorder %v885_v52, 10 }
  0x82   :  { %1085 = vmatprep.subr.bf16.mxu1 %v1319_v44 }
  0x83   :  { %1042 = vmatpush3.bf16.msra.mxu0 %v1171_v59 }
  0x84   :  { %1043 = vmatprep.subr.bf16.mxu0 %v1172_v60 }
  0x85   :  { %1086 = vmatpush3.bf16.msra.mxu1 %v1179_v4 }
  0x86   :  { %1087 = vmatprep.subr.bf16.mxu1 %v1319_v44 }
  0x87   :  { %1044 = vmatpush3.bf16.msra.mxu0 %v1173_v61 }
  0x88   :  { %1097 = vmatprep.subr.bf16.mxu0 %v1319_v44 }
  0x89   :  { %1088 = vmatpush3.bf16.msra.mxu1 %v1180_v5 }
  0x8a   :  { %611 = vmatmul.mubr.bf16.vlgmr.msra.gmra.mrb[4].mxu0 %v92_v63  ;;  %1089 = vmatprep.subr.bf16.mxu1 %v1319_v44 }
  0x8b   :  { %1113 = vmatprep.mubr.msk.bf16.mxu0 %vm1320_vm0, %v1319_v44  ;;  %1098 = vmatpush3.bf16.msra.mxu0 %v1183_v8 }
  0x8c   :  { %1099 = vmatprep.subr.bf16.mxu0 %v1319_v44 }
  0x8d   :  { %1090 = vmatpush3.bf16.msra.mxu1 %v1181_v6 }
  0x8e   :  { %1091 = vmatprep.subr.bf16.mxu1 %v1319_v44 }
  0x8f   :  { %1100 = vmatpush3.bf16.msra.mxu0 %v1184_v9 }
  0x90   :  { %1101 = vmatprep.subr.bf16.mxu0 %v1319_v44 }
  0x91   :  { %1092 = vmatpush3.bf16.msra.mxu1 %v1182_v7 }
  0x93   :  { %1102 = vmatpush3.bf16.msra.mxu0 %v1185_v10 }
  0x94   :  { %1103 = vmatprep.subr.bf16.mxu0 %v1319_v44 }
  0x97   :  { %1104 = vmatpush3.bf16.msra.mxu0 %v1186_v11 }
  0x98   :  { %1105 = vmatprep.subr.bf16.mxu0 %v1319_v44 }
  0x9b   :  { %1106 = vmatpush3.bf16.msra.mxu0 %v1187_v12 }
  0x9c   :  { %1107 = vmatprep.subr.bf16.mxu0 %v1319_v44 }
  0x9f   :  { %1108 = vmatpush3.bf16.msra.mxu0 %v1188_v13 }
  0xa0   :  { %1109 = vmatprep.subr.bf16.mxu0 %v1319_v44 }
  0xa3   :  { %1110 = vmatpush3.bf16.msra.mxu0 %v1189_v40 }
  0xa4   :  { %1111 = vmatprep.subr.bf16.mxu0 %v1319_v44  ;;  %v976_v44 = vld [vmem:[%s1469_s6] ss:$0 sm:$0xff]  ;;  %s1283_s6 = scalar_lea.vmem %s906_s28, 128 }
  0xa5   :  { %p1284_p4 = scmp.ne.s32.totalorder %s906_s28, %s1283_s6  ;;  %p1289_p6 = scmp.lt.s32.totalorder %s1283_s6, %s1283_s6 }
  0xa7   :  { %1112 = vmatpush3.bf16.msra.mxu0 %v1190_v41  ;;  %p1290_p7 = por %p1289_p6, %p1288_p5 }
  0xa9   :  { %p1291_p8 = pnand %p1290_p7, %p1284_p4 }
 0x13d   :  { %v1001_v14 = vpop.f32.mrb[0].mxu0 }
 0x13e   :  { %v1002_v16 = vpop.f32.mrb[1].mxu0 }
 0x13f   :  { %v1003_v17 = vadd.f32 %v1002_v16, %v1001_v14  ;;  %v1004_v18 = vpop.f32.mrb[2].mxu0  ;;  %v1023_v19 = vpop.f32.mrb[0].mxu1 }
 0x140   :  { %v1005_v20 = vpop.f32.mrb[3].mxu0  ;;  %v1024_v22 = vpop.f32.mrb[1].mxu1 }
 0x141   :  { %v533_v21 = vadd.f32 %v1003_v17, %v916_v15  ;;  %v1025_v23 = vadd.f32 %v1024_v22, %v1023_v19  ;;  %v1026_v24 = vpop.f32.mrb[2].mxu1 }
 0x142   :  { %v1027_v25 = vpop.f32.mrb[3].mxu1 }
 0x143   :  { %v573_v26 = vadd.f32 %v1025_v23, %v533_v21 }
 0x147   :  { %v652_v27 = vpop.f32.mrb[4].mxu1 }
 0x148   :  { %v1075_v28 = vpop.f32.mrb[5].mxu1 }
 0x149   :  { %v655_v29 = vpop.f32.mrb[6].mxu1 }
 0x14a   :  { %v1076_v30 = vpop.f32.mrb[7].mxu1 }
 0x15d   :  { %v1045_v31 = vpop.f32.mrb[4].mxu0 }
 0x15e   :  { %v1046_v32 = vpop.f32.mrb[5].mxu0 }
 0x15f   :  { %v1047_v33 = vadd.f32 %v1046_v32, %v1045_v31  ;;  %v1048_v34 = vpop.f32.mrb[6].mxu0 }
 0x160   :  { %v1049_v35 = vpop.f32.mrb[7].mxu0 }
 0x161   :  { %v613_v36 = vadd.f32 %v1047_v33, %v573_v26 }
 0x163   :  { %v653_v37 = vadd.f32 %v652_v27, %v613_v36 }
 0x165   :  { %v658_v38 = vmax.f32 %v653_v37, 0.0 }
 0x167   :  { %v659_v39 = vpack.c.bf16 %v658_v38, %v658_v38 }
 0x169   :  { %1094 = vmatmul.mubr.bf16.vlgmr.msra.gmra.mrb[8].mxu1 %v659_v39 }
 0x23c   :  { %v765_v43 = vpop.f32.mrb[8].mxu1 }
 0x23d   :  { %v766_v45 = vadd.f32 %v967_v42, %v765_v43  ;;  %v1095_v46 = vpop.f32.mrb[9].mxu1 }
 0x23e   :  { %v768_v47 = vpop.f32.mrb[10].mxu1 }
 0x23f   :  { %v771_v48 = vmax.f32 %v766_v45, 0.0  ;;  %v1096_v49 = vpop.f32.mrb[11].mxu1 }
 0x241   :  { %v772_v50 = vpack.c.bf16 %v771_v48, %v771_v48 }
 0x243   :  { %1114 = vmatmul.mubr.bf16.vlgmr.msra.gmra.mrb[8].mxu0 %v772_v50 }
 0x316   :  { %v878_v53 = vpop.f32.mrb[8].mxu0 }
 0x317   :  { %v879_v54 = vadd.f32 %v976_v44, %v878_v53  ;;  %v1115_v55 = vpop.f32.mrb[9].mxu0 }
 0x318   :  { %v881_v56 = vpop.f32.mrb[10].mxu0 }
 0x319   :  { %v1116_v57 = vpop.f32.mrb[11].mxu0  ;;  %v887_v58 = vsel %vm886_vm2, %v879_v54, -1e+30 }
 0x31a   :  { %888 = vmax.xlane.f32.xlu0 %v887_v58 }
 0x3a7   :  { %v889_v59 = vpop.xlane.xlu0 %888 }
 0x3a8   :  { %v890_v60 = vsub.f32 %v887_v58, %v889_v59 }
 0x3aa   :  { %v891_v61 = vmul.f32 1.442695, %v890_v60 }
 0x3ac   :  { %1191 = vpow2.f32 %v891_v61 }
 0x3b6   :  { %v1192_v62 = vpop.eup %1191 }
 0x3b7   :  { %893 = vadd.xlane.f32.xlu0 %v1192_v62 }
 0x444   :  { %v894_v63 = vpop.xlane.xlu0 %893 }
 0x445   :  { %1193 = vrcp.f32 %v894_v63 }
 0x44f   :  { %v1194_v0 = vpop.eup %1193 }
 0x450   :  { %v896_v1 = vmul.f32 %v1194_v0, %v1192_v62 }
 0x452   :  { %898 = vst.msk [vmem:[#allocation10] sm:$0xff] %vm897_vm3, %v896_v1 }
 0x453   :  { %1294 = shalt.err (!%p1291_p8)
}
 0x454   :  { %s1295_s8 = scalar_lea.hbm %s1470_s7, 128 }
 0x455   :  { %p1296_p9 = scmp.ne.s32.totalorder %s1470_s7, %s1295_s8  ;;  %p1299_p10 = scmp.lt.u32.totalorder %s1295_s8, %s1470_s7 }
 0x457   :  { %p1301_p11 = pnand %p1299_p10, %p1296_p9 }
 0x459   :  { %1304 = shalt.err (!%p1301_p11)
}
 0x45a   :  { %908 = dma.vmem_to_hbm [thread:$0]  %s906_s28, 128, %s1470_s7, [#allocation4]  }
 0x45b   :  { %1311 = dma.done.wait [#allocation4], 128  }
 0x45c   :  { %1312 = vsyncadd [#allocation4], 4294967168 }
 0x45d   :  { %912 = vsyncpa [#allocation3], 1 }
 0x45e   :  { %913 = vsyncpa [#allocation6], 1 }
 0x45f   :  { %914 = vsyncpa [#allocation9], 1 }
 0x460   :  { %915 = vsyncpa [#allocation4], 1 }

</bundles_post_ra>
